<compile_context>
chip_gen: v7x
topology: tpu7x:2x2x1
jax: 0.10.0
libtpu: 0.0.40
codegen_flags: <defaults>
</compile_context>

<pallas_src>
import jax
import jax.numpy as jnp
from jax.experimental import pallas as pl
from jax.experimental.pallas import tpu as pltpu


def _round_up(x: int, m: int) -> int:
    return (x + m - 1) // m * m


def _patch_embed_kernel(a_ref, w_ref, b_ref, o_ref):
    # a_ref: (tm, K) patch rows (bf16), w_ref: (K, E) resident projection,
    # b_ref: (1, E) resident bias (f32), o_ref: (tm, E) output tile.
    acc = jnp.dot(a_ref[...], w_ref[...], preferred_element_type=jnp.float32)
    o_ref[...] = (acc + b_ref[...].astype(jnp.float32)).astype(o_ref.dtype)


def patch_embed_forward(x, weight, bias, patch_size: int,
                        *, compute_dtype=jnp.bfloat16):
    """x: (B, C, H, W); weight: (E, C, P, P); bias: (E,). Returns (B, N, E)."""
    B, C, H, W = x.shape
    P = patch_size
    E = weight.shape[0]
    Hp, Wp = H // P, W // P
    N = Hp * Wp
    K = C * P * P
    M = B * N
    out_dtype = x.dtype

    # im2col in the wrapper; the bf16 cast is folded in so the transpose pass
    # writes half the HBM bytes.  K is ordered (c, dh, dw) to match the OIHW
    # Conv2d weight layout.
    # TODO(synk): fuse patch extraction into the kernel (grid over (B, Hp),
    # reshuffle on VMEM-resident rows) to remove this separate HBM pass.
    xc = x.astype(compute_dtype)
    patches = (
        xc.reshape(B, C, Hp, P, Wp, P)
        .transpose(0, 2, 4, 1, 3, 5)
        .reshape(M, K)
    )
    w_flat = weight.astype(compute_dtype).reshape(E, K).T      # (K, E)
    bias2d = bias.astype(jnp.float32).reshape(1, E)

    in_b = jnp.dtype(compute_dtype).itemsize
    out_b = jnp.dtype(out_dtype).itemsize

    # --- tile selection / VMEM budget --------------------------------------
    # Big row tiles => fewer grid steps and long contiguous DMAs; shrink only
    # if the working set would blow the VMEM budget (v7x: 64 MiB physical,
    # v5e: 16 MiB scoped default, hence explicit vmem_limit_bytes below).
    def working_set(t):
        return (2 * t * K * in_b          # patch tile, double-buffered
                + 2 * K * E * in_b        # resident weight (alloc is 2x)
                + 2 * E * 4               # resident bias
                + 2 * t * E * out_b)      # output tile, double-buffered

    tm = min(512, _round_up(M, 8))
    VMEM_BUDGET = 40 * 1024 * 1024
    while tm > 64 and working_set(tm) > VMEM_BUDGET:
        tm //= 2
    tm = max(8, _round_up(tm, 8))
    vmem_limit = int(min(max(working_set(tm) + (4 << 20), 16 << 20), 48 << 20))

    grid = (pl.cdiv(M, tm),)   # ragged last block => Pallas masks OOB writes

    out = pl.pallas_call(
        _patch_embed_kernel,
        out_shape=jax.ShapeDtypeStruct((M, E), out_dtype),
        grid=grid,
        in_specs=[
            pl.BlockSpec((tm, K), lambda i: (i, 0)),   # patches: streamed over M
            pl.BlockSpec((K, E), lambda i: (0, 0)),    # weight: fetched once, resident
            pl.BlockSpec((1, E), lambda i: (0, 0)),    # bias: fetched once, resident
        ],
        out_specs=pl.BlockSpec((tm, E), lambda i: (i, 0)),
        compiler_params=pltpu.CompilerParams(
            dimension_semantics=("parallel",),          # shards M over v7x's 2 TCs
            vmem_limit_bytes=vmem_limit,
        ),
    )(patches, w_flat, bias2d)

    return out.reshape(B, N, E)


class PatchEmbed:
    """Image to Patch Embedding (Pallas TPU)."""

    def __init__(self, img_size=224, patch_size=16, in_chans=3, embed_dim=768,
                 *, key=None, dtype=jnp.float32):
        self.img_size = img_size
        self.patch_size = patch_size
        self.num_patches = (img_size // patch_size) * (img_size // patch_size)
        if key is None:
            key = jax.random.PRNGKey(0)
        kw, kb = jax.random.split(key)
        fan_in = in_chans * patch_size * patch_size
        bound = 1.0 / (fan_in ** 0.5)
        # Matches nn.Conv2d default init: U(-1/sqrt(fan_in), 1/sqrt(fan_in)).
        self.weight = jax.random.uniform(
            kw, (embed_dim, in_chans, patch_size, patch_size),
            minval=-bound, maxval=bound, dtype=dtype)
        self.bias = jax.random.uniform(
            kb, (embed_dim,), minval=-bound, maxval=bound, dtype=dtype)

    def __call__(self, x):
        return patch_embed_forward(x, self.weight, self.bias, self.patch_size)


def _reference(x, weight, bias):
    """Plain-XLA strided conv, then flatten(2).transpose(1, 2)."""
    E = weight.shape[0]
    P = weight.shape[-1]
    ref = jax.lax.conv_general_dilated(
        x, weight, window_strides=(P, P), padding="VALID",
        dimension_numbers=("NCHW", "OIHW", "NCHW"))
    ref = ref + bias.reshape(1, E, 1, 1)
    B = x.shape[0]
    N = ref.shape[2] * ref.shape[3]
    return ref.reshape(B, E, N).transpose(0, 2, 1)


if __name__ == "__main__":
    key = jax.random.PRNGKey(0)

    # Config 1: 32x32 image, 8x8 patches, 3 channels, embed 128 (M divides tm).
    k_x, k_p, key = jax.random.split(key, 3)
    B, C, IMG, PATCH, EMBED = 2, 3, 32, 8, 128
    x = jax.random.normal(k_x, (B, C, IMG, IMG), dtype=jnp.float32)
    mod = PatchEmbed(img_size=IMG, patch_size=PATCH, in_chans=C,
                     embed_dim=EMBED, key=k_p)
    out = jax.block_until_ready(mod(x))
    N = (IMG // PATCH) ** 2
    assert out.shape == (B, N, EMBED) and out.dtype == x.dtype
    ref = _reference(x, mod.weight, mod.bias)
    err1 = float(jnp.max(jnp.abs(out - ref)))
    assert jnp.allclose(out, ref, atol=3e-2, rtol=2e-2), err1

    # Config 2: ragged M (24x24 image -> N=9 per image, M=18) and non-128
    # embed dim; exercises the no-pad boundary-masked last block.
    k_x2, k_p2, key = jax.random.split(key, 3)
    B2, C2, IMG2, PATCH2, EMBED2 = 2, 3, 24, 8, 192
    x2 = jax.random.normal(k_x2, (B2, C2, IMG2, IMG2), dtype=jnp.float32)
    mod2 = PatchEmbed(img_size=IMG2, patch_size=PATCH2, in_chans=C2,
                      embed_dim=EMBED2, key=k_p2)
    out2 = jax.block_until_ready(mod2(x2))
    N2 = (IMG2 // PATCH2) ** 2
    assert out2.shape == (B2, N2, EMBED2) and out2.dtype == x2.dtype
    ref2 = _reference(x2, mod2.weight, mod2.bias)
    err2 = float(jnp.max(jnp.abs(out2 - ref2)))
    assert jnp.allclose(out2, ref2, atol=3e-2, rtol=2e-2), err2

    print("KERNEL_OK")
</pallas_src>

<mosaic_0001>
module attributes {stable_mosaic.version = 11 : i64} {
  func.func @_patch_embed_kernel(%arg0: i32, %arg1: memref<32x192xbf16, #tpu.memory_space<vmem>>, %arg2: memref<192x128xbf16, #tpu.memory_space<vmem>>, %arg3: memref<1x128xf32, #tpu.memory_space<vmem>>, %arg4: memref<32x128xf32, #tpu.memory_space<vmem>>) attributes {dimension_semantics = [#tpu.dimension_semantics<parallel>], iteration_bounds = array<i64: 1>, scalar_prefetch = 0 : i64, scratch_operands = 0 : i64, tpu.core_type = #tpu.core_type<tc>, window_params = [{transform_indices = @transform_0, window_bounds = array<i64: 32, 192>}, {pipeline_mode = #tpu.pipeline_mode<synchronous>, transform_indices = @transform_1, window_bounds = array<i64: 192, 128>}, {pipeline_mode = #tpu.pipeline_mode<synchronous>, transform_indices = @transform_2, window_bounds = array<i64: 1, 128>}, {transform_indices = @transform_3, window_bounds = array<i64: 32, 128>}]} {
    %c0 = arith.constant 0 : index
    %c0_0 = arith.constant 0 : index
    %0 = vector.load %arg1[%c0, %c0_0] : memref<32x192xbf16, #tpu.memory_space<vmem>>, vector<32x192xbf16>
    %c0_1 = arith.constant 0 : index
    %c0_2 = arith.constant 0 : index
    %1 = vector.load %arg2[%c0_1, %c0_2] : memref<192x128xbf16, #tpu.memory_space<vmem>>, vector<192x128xbf16>
    %cst = arith.constant dense<0.000000e+00> : vector<32x128xf32>
    %2 = tpu.matmul %0, %1, %cst {dimension_numbers = #tpu.dot_dimension_numbers<[1], [0], [0], [1], [0, 0, 1, 1], [], []>} : vector<32x192xbf16>, vector<192x128xbf16>, vector<32x128xf32> -> vector<32x128xf32>
    %c0_3 = arith.constant 0 : index
    %c0_4 = arith.constant 0 : index
    %3 = vector.load %arg3[%c0_3, %c0_4] : memref<1x128xf32, #tpu.memory_space<vmem>>, vector<1x128xf32>
    %4 = vector.broadcast %3 : vector<1x128xf32> to vector<32x128xf32>
    %5 = arith.addf %2, %4 : vector<32x128xf32>
    %c0_5 = arith.constant 0 : index
    %c0_6 = arith.constant 0 : index
    %6 = vector.load %arg4[%c0_5, %c0_6] : memref<32x128xf32, #tpu.memory_space<vmem>>, vector<32x128xf32>
    tpu.vector_store %arg4[%c0_5, %c0_6], %5 {strides = array<i32>} : memref<32x128xf32, #tpu.memory_space<vmem>>, vector<32x128xf32>,
    return
  }
  func.func @transform_0(%arg0: i32) -> (i32, i32) {
    %c0_i32 = arith.constant 0 : i32
    %c0_i32_0 = arith.constant 0 : i32
    return %arg0, %c0_i32 : i32, i32
  }
  func.func @transform_1(%arg0: i32) -> (i32, i32) {
    %c0_i32 = arith.constant 0 : i32
    %c0_i32_0 = arith.constant 0 : i32
    %c0_i32_1 = arith.constant 0 : i32
    return %c0_i32, %c0_i32_0 : i32, i32
  }
  func.func @transform_2(%arg0: i32) -> (i32, i32) {
    %c0_i32 = arith.constant 0 : i32
    %c0_i32_0 = arith.constant 0 : i32
    %c0_i32_1 = arith.constant 0 : i32
    return %c0_i32, %c0_i32_0 : i32, i32
  }
  func.func @transform_3(%arg0: i32) -> (i32, i32) {
    %c0_i32 = arith.constant 0 : i32
    %c0_i32_0 = arith.constant 0 : i32
    return %arg0, %c0_i32 : i32, i32
  }
}

</mosaic_0001>

<bundles_post_ra>
// kernel: tpu_custom_call.1
= control target key start
LH: loop header
LB: loop body
LE: loop exit
PB: predicated region body
PF: predicated region fallthrough
CT: control target
= control target key end

     0   :  { %8 = vsyncpa [#allocation3], 0  ;;  %s461_s0 = inlined_call_operand.hbm [shape: bf16[32,192], index: 0, kind: input, shape index: {}]   ;;  %s462_s1 = inlined_call_operand.hbm [shape: bf16[192,128], index: 1, kind: input, shape index: {}]   ;;  %s463_s2 = inlined_call_operand.vmem [shape: f32[1,128], index: 2, kind: input, shape index: {}]   ;;  %s464_s3 = inlined_call_operand.hbm [shape: f32[32,128], index: 3, kind: output, shape index: {}]  }
   0x1   :  { %9 = vsyncpa [#allocation6], 0 }
   0x2   :  { %10 = vsyncpa [#allocation4], 0  ;;  %s388_s12 = smov [#allocation2]   ;;  %s316_s16 = scalar_lea.hbm %s461_s0, 512 }
   0x3   :  { %s16_s13 = sshll.u32 %s388_s12, 4  ;;  %p317_p0 = scmp.ne.s32.totalorder %s461_s0, %s316_s16  ;;  %s17_s13 = int_to_ptr.vmem [resolvable:$true] %s16_s13 }
   0x4   :  { %p320_p1 = scmp.lt.u32.totalorder %s316_s16, %s461_s0 }
   0x6   :  { %p322_p2 = pnand %p320_p1, %p317_p0 }
   0x8   :  { %325 = shalt.err (!%p322_p2)
}
   0x9   :  { %s326_s21 = scalar_lea.vmem %s17_s13, 512  ;;  %p331_p4 = scmp.lt.s32.totalorder %s17_s13, %s17_s13 }
   0xa   :  { %p327_p3 = scmp.ne.s32.totalorder %s17_s13, %s326_s21  ;;  %p332_p5 = scmp.lt.s32.totalorder %s326_s21, %s326_s21 }
   0xc   :  { %p333_p6 = por %p332_p5, %p331_p4 }
   0xe   :  { %p334_p7 = pnand %p333_p6, %p327_p3 }
  0x10   :  { %337 = shalt.err (!%p334_p7)
}
  0x11   :  { %s389_s22 = smov 128   ;;  %s390_s23 = smov 8  }
  0x12   :  { %22 = dma.hbm_to_vmem [thread:$0]  %s461_s0, 512, %s17_s13, [#allocation3], %s389_s22, %s389_s22, %s390_s23  }
  0x13   :  { %s391_s26 = smov [#allocation5]   ;;  %s338_s30 = scalar_lea.hbm %s462_s1, 1536 }
  0x14   :  { %s28_s27 = sshll.u32 %s391_s26, 4  ;;  %p339_p8 = scmp.ne.s32.totalorder %s462_s1, %s338_s30  ;;  %s29_s27 = int_to_ptr.vmem [resolvable:$true] %s28_s27 }
  0x15   :  { %p342_p9 = scmp.lt.u32.totalorder %s338_s30, %s462_s1 }
  0x17   :  { %p344_p10 = pnand %p342_p9, %p339_p8 }
  0x19   :  { %347 = shalt.err (!%p344_p10)
}
  0x1a   :  { %s348_s8 = scalar_lea.vmem %s29_s27, 1536  ;;  %p353_p12 = scmp.lt.s32.totalorder %s29_s27, %s29_s27 }
  0x1b   :  { %p349_p11 = scmp.ne.s32.totalorder %s29_s27, %s348_s8  ;;  %p354_p13 = scmp.lt.s32.totalorder %s348_s8, %s348_s8 }
  0x1d   :  { %p355_p0 = por %p354_p13, %p353_p12 }
  0x1f   :  { %p356_p1 = pnand %p355_p0, %p349_p11 }
  0x21   :  { %359 = shalt.err (!%p356_p1)
}
  0x22   :  { %s392_s0 = smov 64   ;;  %s393_s9 = smov 4  }
  0x23   :  { %34 = dma.hbm_to_vmem [thread:$0]  %s462_s1, 1536, %s29_s27, [#allocation6], %s392_s0, %s392_s0, %s393_s9  }
  0x24   :  { %382 = dma.done.wait [#allocation3], 512  }
  0x25   :  { %383 = vsyncadd [#allocation3], 4294966784 }
  0x26   :  { %384 = dma.done.wait [#allocation6], 1536  }
  0x27   :  { %385 = vsyncadd [#allocation6], 4294965760  ;;  %v394_v0 = vmov 0   ;;  %v298_v1 = vld [vmem:[#allocation5] sm:$0xff]   ;;  %v299_v2 = vld [vmem:[#allocation5 + $0x8] sm:$0xff]   ;;  %vm169_vm0 = vcmask 523264  }
  0x28   :  { %176 = vmatprep.subr.bf16.mxu0 %v394_v0  ;;  %266 = vmatprep.subr.bf16.mxu1 %v394_v0  ;;  %v300_v3 = vld [vmem:[#allocation5 + $0x10] sm:$0xff]   ;;  %v301_v4 = vld [vmem:[#allocation5 + $0x18] sm:$0xff]   ;;  %v312_v5 = vld [vmem:[#allocation2 + $0x4] ss:$8 sps:$4 sm:$0xff]   ;;  %s395_s13 = smov [#allocation7]  }
  0x29   :  { %177 = vmatpush1.bf16.msra.mxu0 %v298_v1  ;;  %278 = vmatpush1.bf16.msra.mxu1 %v298_v1  ;;  %v302_v6 = vld [vmem:[#allocation5 + $0x20] sm:$0xff]   ;;  %v315_v7 = vld [vmem:[#allocation2 + $0x14] ss:$8 sps:$4 sm:$0xff]   ;;  %v303_v8 = vld [vmem:[#allocation5 + $0x28] sm:$0xff]   ;;  %s234_s14 = sshll.u32 %s395_s13, 4  ;;  %s235_s14 = int_to_ptr.vmem [resolvable:$true] %s234_s14 }
  0x2a   :  { %178 = vmatprep.subr.bf16.mxu0 %v394_v0  ;;  %267 = vmatprep.subr.bf16.mxu1 %v394_v0  ;;  %v304_v9 = vld [vmem:[#allocation5 + $0x30] sm:$0xff]   ;;  %v305_v10 = vld [vmem:[#allocation5 + $0x38] sm:$0xff]   ;;  %v306_v11 = vld [vmem:[#allocation5 + $0x40] sm:$0xff]   ;;  %p365_p3 = scmp.lt.s32.totalorder %s235_s14, %s235_s14 }
  0x2b   :  { %264 = vmatprep.mubr.msk.bf16.mxu0 %vm169_vm0, %v312_v5  ;;  %265 = vmatprep.mubr.msk.bf16.mxu1 %vm169_vm0, %v315_v7  ;;  %v307_v12 = vld [vmem:[#allocation5 + $0x48] sm:$0xff]   ;;  %v308_v13 = vld [vmem:[#allocation5 + $0x50] sm:$0xff]   ;;  %v309_v14 = vld [vmem:[#allocation5 + $0x58] sm:$0xff]  }
  0x2c   :  { %v310_v15 = vld [vmem:[#allocation2] ss:$8 sps:$4 sm:$0xff]   ;;  %v313_v16 = vld [vmem:[#allocation2 + $0x10] ss:$8 sps:$4 sm:$0xff]  }
  0x2d   :  { %179 = vmatpush1.bf16.msra.mxu0 %v299_v2  ;;  %279 = vmatpush1.bf16.msra.mxu1 %v299_v2  ;;  %v247_v17 = vld [vmem:[%s463_s2] ss:$0 sm:$0xff]  ;;  %s360_s2 = scalar_lea.vmem %s235_s14, 512 }
  0x2e   :  { %180 = vmatprep.subr.bf16.mxu0 %v394_v0  ;;  %268 = vmatprep.subr.bf16.mxu1 %v394_v0  ;;  %p361_p2 = scmp.ne.s32.totalorder %s235_s14, %s360_s2  ;;  %p366_p4 = scmp.lt.s32.totalorder %s360_s2, %s360_s2 }
  0x30   :  { %p367_p5 = por %p366_p4, %p365_p3 }
  0x31   :  { %181 = vmatpush1.bf16.msra.mxu0 %v300_v3  ;;  %280 = vmatpush1.bf16.msra.mxu1 %v300_v3 }
  0x32   :  { %182 = vmatprep.subr.bf16.mxu0 %v394_v0  ;;  %269 = vmatprep.subr.bf16.mxu1 %v394_v0  ;;  %p368_p6 = pnand %p367_p5, %p361_p2 }
  0x35   :  { %183 = vmatpush1.bf16.msra.mxu0 %v301_v4  ;;  %281 = vmatpush1.bf16.msra.mxu1 %v301_v4 }
  0x36   :  { %184 = vmatprep.subr.bf16.mxu0 %v394_v0  ;;  %270 = vmatprep.subr.bf16.mxu1 %v394_v0 }
  0x39   :  { %185 = vmatpush1.bf16.msra.mxu0 %v302_v6  ;;  %282 = vmatpush1.bf16.msra.mxu1 %v302_v6 }
  0x3a   :  { %186 = vmatprep.subr.bf16.mxu0 %v394_v0  ;;  %271 = vmatprep.subr.bf16.mxu1 %v394_v0 }
  0x3d   :  { %187 = vmatpush1.bf16.msra.mxu0 %v303_v8  ;;  %283 = vmatpush1.bf16.msra.mxu1 %v303_v8 }
  0x3e   :  { %188 = vmatprep.subr.bf16.mxu0 %v394_v0  ;;  %272 = vmatprep.subr.bf16.mxu1 %v394_v0 }
  0x41   :  { %189 = vmatpush1.bf16.msra.mxu0 %v304_v9  ;;  %284 = vmatpush1.bf16.msra.mxu1 %v304_v9 }
  0x42   :  { %190 = vmatprep.subr.bf16.mxu0 %v394_v0  ;;  %273 = vmatprep.subr.bf16.mxu1 %v394_v0 }
  0x45   :  { %191 = vmatpush1.bf16.msra.mxu0 %v305_v10  ;;  %285 = vmatpush1.bf16.msra.mxu1 %v305_v10 }
  0x46   :  { %192 = vmatprep.subr.bf16.mxu0 %v394_v0  ;;  %274 = vmatprep.subr.bf16.mxu1 %v394_v0 }
  0x49   :  { %193 = vmatpush1.bf16.msra.mxu0 %v306_v11  ;;  %286 = vmatpush1.bf16.msra.mxu1 %v306_v11 }
  0x4a   :  { %194 = vmatprep.subr.bf16.mxu0 %v394_v0  ;;  %275 = vmatprep.subr.bf16.mxu1 %v394_v0 }
  0x4d   :  { %195 = vmatpush1.bf16.msra.mxu0 %v307_v12  ;;  %287 = vmatpush1.bf16.msra.mxu1 %v307_v12 }
  0x4e   :  { %196 = vmatprep.subr.bf16.mxu0 %v394_v0  ;;  %276 = vmatprep.subr.bf16.mxu1 %v394_v0 }
  0x51   :  { %197 = vmatpush1.bf16.msra.mxu0 %v308_v13  ;;  %288 = vmatpush1.bf16.msra.mxu1 %v308_v13 }
  0x52   :  { %198 = vmatprep.subr.bf16.mxu0 %v394_v0  ;;  %277 = vmatprep.subr.bf16.mxu1 %v394_v0 }
  0x55   :  { %199 = vmatpush1.bf16.msra.mxu0 %v309_v14  ;;  %289 = vmatpush1.bf16.msra.mxu1 %v309_v14 }
  0x58   :  { %209 = vmatmul.mubr.bf16.vlgmr.msra.gmra.mrb[0].mxu0 %v310_v15  ;;  %217 = vmatmul.mubr.bf16.vlgmr.msra.gmra.mrb[0].mxu1 %v313_v16 }
 0x12b   :  { %v210_v18 = vpop.f32.mrb[0].mxu0  ;;  %v218_v19 = vpop.f32.mrb[0].mxu1 }
 0x12c   :  { %v211_v20 = vadd.f32 %v247_v17, %v210_v18  ;;  %v219_v21 = vadd.f32 %v247_v17, %v218_v19  ;;  %v212_v22 = vpop.f32.mrb[1].mxu0  ;;  %v220_v23 = vpop.f32.mrb[1].mxu1 }
 0x12d   :  { %v213_v24 = vpop.f32.mrb[2].mxu0  ;;  %v221_v25 = vpop.f32.mrb[2].mxu1 }
 0x12e   :  { %225 = vst [vmem:[#allocation7] sm:$0xff] %v211_v20  ;;  %227 = vst [vmem:[#allocation7 + $0x10] sm:$0xff] %v219_v21  ;;  %v214_v26 = vadd.f32 %v247_v17, %v213_v24  ;;  %v222_v27 = vadd.f32 %v247_v17, %v221_v25  ;;  %v215_v28 = vpop.f32.mrb[3].mxu0  ;;  %v223_v29 = vpop.f32.mrb[3].mxu1 }
 0x130   :  { %226 = vst [vmem:[#allocation7 + $0x8] sm:$0xff] %v214_v26  ;;  %228 = vst [vmem:[#allocation7 + $0x18] sm:$0xff] %v222_v27 }
 0x131   :  { %371 = shalt.err (!%p368_p6)
}
 0x132   :  { %s372_s17 = scalar_lea.hbm %s464_s3, 512 }
 0x133   :  { %p373_p7 = scmp.ne.s32.totalorder %s464_s3, %s372_s17  ;;  %p376_p8 = scmp.lt.u32.totalorder %s372_s17, %s464_s3 }
 0x135   :  { %p378_p9 = pnand %p376_p8, %p373_p7 }
 0x137   :  { %381 = shalt.err (!%p378_p9)
}
 0x138   :  { %240 = dma.vmem_to_hbm [thread:$0]  %s235_s14, 512, %s464_s3, [#allocation4], %s389_s22, %s389_s22, %s390_s23  }
 0x139   :  { %386 = dma.done.wait [#allocation4], 512  }
 0x13a   :  { %387 = vsyncadd [#allocation4], 4294966784 }
 0x13b   :  { %244 = vsyncpa [#allocation3], 1 }
 0x13c   :  { %245 = vsyncpa [#allocation6], 1 }
 0x13d   :  { %246 = vsyncpa [#allocation4], 1 }

</bundles_post_ra>
